<compile_context>
chip_gen: v5e
topology: v5e:2x2
jax: 0.10.0
libtpu: 0.0.40
codegen_flags: <defaults>
</compile_context>

<pallas_src>
import jax
import jax.numpy as jnp
from jax.experimental import pallas as pl
from jax.experimental.pallas import tpu as pltpu

IN_DIM = 28 * 28        # 784
HID = 64
OUT_DIM = 10

# Lane-padded dims (multiples of 128) for MXU / vreg efficiency.
IN_PAD = 896            # 7 * 128
HID_PAD = 128
OUT_PAD = 128
NEG_INF = -1e30         # bias value for padded logit columns


def mlp_kernel(x_ref,
               w1_ref, b1_ref,
               w2_ref, b2_ref,
               w3_ref, b3_ref,
               w4_ref, b4_ref,
               o_ref):
    # x tile: (TB, IN_PAD) bf16; weights/biases are VMEM-resident across the grid.
    x = x_ref[...]

    h = jnp.dot(x, w1_ref[...], preferred_element_type=jnp.float32) + b1_ref[...]
    h = jnp.maximum(h, 0.0).astype(jnp.bfloat16)                     # relu(fc1)

    h = jnp.dot(h, w2_ref[...], preferred_element_type=jnp.float32) + b2_ref[...]
    h = jnp.maximum(h, 0.0).astype(jnp.bfloat16)                     # relu(fc2)

    h = jnp.dot(h, w3_ref[...], preferred_element_type=jnp.float32) + b3_ref[...]
    h = jnp.maximum(h, 0.0).astype(jnp.bfloat16)                     # relu(fc3)

    # b4 is padded with NEG_INF for classes >= OUT_DIM, so the padded logit
    # columns drop out of the softmax normalizer automatically.
    logits = jnp.dot(h, w4_ref[...], preferred_element_type=jnp.float32) + b4_ref[...]

    # Numerically stable log_softmax along the class axis (f32).
    m = jnp.max(logits, axis=1, keepdims=True)
    shifted = logits - m
    lse = jnp.log(jnp.sum(jnp.exp(shifted), axis=1, keepdims=True))
    o_ref[...] = shifted - lse


def _round_up(x, m):
    return ((x + m - 1) // m) * m


def prepare_params(params):
    """Pad params to lane-dense (multiple-of-128) shapes; cast weights to bf16."""
    (w1, b1, w2, b2, w3, b3, w4, b4) = params

    def pad2(a, rows, cols, fill=0.0):
        return jnp.pad(a, ((0, rows - a.shape[0]), (0, cols - a.shape[1])),
                       constant_values=fill)

    w1p = pad2(w1, IN_PAD, HID_PAD).astype(jnp.bfloat16)
    w2p = pad2(w2, HID_PAD, HID_PAD).astype(jnp.bfloat16)
    w3p = pad2(w3, HID_PAD, HID_PAD).astype(jnp.bfloat16)
    w4p = pad2(w4, HID_PAD, OUT_PAD).astype(jnp.bfloat16)
    b1p = pad2(b1, 1, HID_PAD).astype(jnp.float32)
    b2p = pad2(b2, 1, HID_PAD).astype(jnp.float32)
    b3p = pad2(b3, 1, HID_PAD).astype(jnp.float32)
    b4p = pad2(b4, 1, OUT_PAD, fill=NEG_INF).astype(jnp.float32)
    return (w1p, b1p, w2p, b2p, w3p, b3p, w4p, b4p)


def neural_net_forward(x, params, *, block_b=512):
    """x: (B, 784) f32.  params: raw (in, out) weights / (1, out) biases, f32."""
    B = x.shape[0]
    tb = min(block_b, _round_up(B, 8))          # batch tile (kept modest for v5e/v7x)
    b_pad = _round_up(B, tb)
    grid = (b_pad // tb,)

    # Pad batch to a multiple of the tile, features to 896; cast stream to bf16.
    xp = jnp.pad(x, ((0, b_pad - B), (0, IN_PAD - IN_DIM))).astype(jnp.bfloat16)
    (w1, b1, w2, b2, w3, b3, w4, b4) = prepare_params(params)

    const = lambda i: (0, 0)
    in_specs = [
        pl.BlockSpec((tb, IN_PAD), lambda i: (i, 0)),   # x: streamed, double-buffered
        pl.BlockSpec((IN_PAD, HID_PAD), const),         # w1 (resident)
        pl.BlockSpec((1, HID_PAD), const),              # b1
        pl.BlockSpec((HID_PAD, HID_PAD), const),        # w2
        pl.BlockSpec((1, HID_PAD), const),              # b2
        pl.BlockSpec((HID_PAD, HID_PAD), const),        # w3
        pl.BlockSpec((1, HID_PAD), const),              # b3
        pl.BlockSpec((HID_PAD, OUT_PAD), const),        # w4
        pl.BlockSpec((1, OUT_PAD), const),              # b4
    ]
    out_specs = pl.BlockSpec((tb, OUT_PAD), lambda i: (i, 0))   # lane-dense output

    flops = 2 * b_pad * (IN_PAD * HID_PAD + 2 * HID_PAD * HID_PAD + HID_PAD * OUT_PAD)
    bytes_accessed = (xp.size * 2
                      + (w1.size + w2.size + w3.size + w4.size) * 2
                      + (b1.size + b2.size + b3.size + b4.size) * 4
                      + b_pad * OUT_PAD * 4)

    out_padded = pl.pallas_call(
        mlp_kernel,
        out_shape=jax.ShapeDtypeStruct((b_pad, OUT_PAD), jnp.float32),
        grid=grid,
        in_specs=in_specs,
        out_specs=out_specs,
        compiler_params=pltpu.CompilerParams(
            dimension_semantics=("parallel",),      # shard batch tiles across cores
            vmem_limit_bytes=48 << 20,              # safe on v5e/v6e/v7x
        ),
        cost_estimate=pl.CostEstimate(
            flops=flops,
            transcendentals=b_pad * (OUT_PAD + 1),
            bytes_accessed=bytes_accessed,
        ),
    )(xp, w1, b1, w2, b2, w3, b3, w4, b4)

    return out_padded[:B, :OUT_DIM]


def init_params(key):
    """Deterministic init mirroring PyTorch's default Linear init:
    U(-1/sqrt(fan_in), 1/sqrt(fan_in)), weights stored as (in, out)."""
    def linear(k, fan_in, fan_out):
        kw, kb = jax.random.split(k)
        bound = 1.0 / jnp.sqrt(fan_in)
        w = jax.random.uniform(kw, (fan_in, fan_out), jnp.float32, -bound, bound)
        b = jax.random.uniform(kb, (1, fan_out), jnp.float32, -bound, bound)
        return w, b

    k1, k2, k3, k4 = jax.random.split(key, 4)
    w1, b1 = linear(k1, IN_DIM, HID)
    w2, b2 = linear(k2, HID, HID)
    w3, b3 = linear(k3, HID, HID)
    w4, b4 = linear(k4, HID, OUT_DIM)
    return (w1, b1, w2, b2, w3, b3, w4, b4)


def reference_forward(x, params, *, match_bf16=True):
    """Pure-JAX reference. match_bf16=True mirrors the kernel's bf16 streaming
    path (f32 accumulation); False is the plain f32 PyTorch-equivalent forward."""
    (w1, b1, w2, b2, w3, b3, w4, b4) = params
    cast = (lambda a: a.astype(jnp.bfloat16)) if match_bf16 else (lambda a: a)
    h = jnp.maximum(jnp.dot(cast(x), cast(w1), preferred_element_type=jnp.float32) + b1, 0.0)
    h = jnp.maximum(jnp.dot(cast(h), cast(w2), preferred_element_type=jnp.float32) + b2, 0.0)
    h = jnp.maximum(jnp.dot(cast(h), cast(w3), preferred_element_type=jnp.float32) + b3, 0.0)
    logits = jnp.dot(cast(h), cast(w4), preferred_element_type=jnp.float32) + b4
    return jax.nn.log_softmax(logits, axis=1)


if __name__ == "__main__":
    key = jax.random.PRNGKey(0)
    kx, kp = jax.random.split(key)

    B = 8
    x = jax.random.normal(kx, (B, IN_DIM), dtype=jnp.float32)
    params = init_params(kp)

    out = neural_net_forward(x, params)
    out = jax.block_until_ready(out)
    assert out.shape == (B, OUT_DIM)

    # Tight check vs a bf16-matched reference (same numerics as the kernel).
    ref_bf16 = reference_forward(x, params, match_bf16=True)
    assert jnp.allclose(out, ref_bf16, atol=5e-3, rtol=5e-3), "mismatch vs bf16 reference"

    # Loose sanity check vs the plain f32 PyTorch-equivalent forward.
    ref_f32 = reference_forward(x, params, match_bf16=False)
    assert jnp.allclose(out, ref_f32, atol=5e-2, rtol=5e-2), "mismatch vs f32 reference"

    print("KERNEL_OK")
</pallas_src>

<mosaic_0001>
module attributes {stable_mosaic.version = 11 : i64} {
  func.func @mlp_kernel(%arg0: i32, %arg1: memref<8x896xbf16, #tpu.memory_space<vmem>>, %arg2: memref<896x128xbf16, #tpu.memory_space<vmem>>, %arg3: memref<1x128xf32, #tpu.memory_space<vmem>>, %arg4: memref<128x128xbf16, #tpu.memory_space<vmem>>, %arg5: memref<1x128xf32, #tpu.memory_space<vmem>>, %arg6: memref<128x128xbf16, #tpu.memory_space<vmem>>, %arg7: memref<1x128xf32, #tpu.memory_space<vmem>>, %arg8: memref<128x128xbf16, #tpu.memory_space<vmem>>, %arg9: memref<1x128xf32, #tpu.memory_space<vmem>>, %arg10: memref<8x128xf32, #tpu.memory_space<vmem>>) attributes {dimension_semantics = [#tpu.dimension_semantics<parallel>], iteration_bounds = array<i64: 1>, scalar_prefetch = 0 : i64, scratch_operands = 0 : i64, tpu.core_type = #tpu.core_type<tc>, window_params = [{transform_indices = @transform_0, window_bounds = array<i64: 8, 896>}, {pipeline_mode = #tpu.pipeline_mode<synchronous>, transform_indices = @transform_1, window_bounds = array<i64: 896, 128>}, {pipeline_mode = #tpu.pipeline_mode<synchronous>, transform_indices = @transform_2, window_bounds = array<i64: 1, 128>}, {pipeline_mode = #tpu.pipeline_mode<synchronous>, transform_indices = @transform_3, window_bounds = array<i64: 128, 128>}, {pipeline_mode = #tpu.pipeline_mode<synchronous>, transform_indices = @transform_4, window_bounds = array<i64: 1, 128>}, {pipeline_mode = #tpu.pipeline_mode<synchronous>, transform_indices = @transform_5, window_bounds = array<i64: 128, 128>}, {pipeline_mode = #tpu.pipeline_mode<synchronous>, transform_indices = @transform_6, window_bounds = array<i64: 1, 128>}, {pipeline_mode = #tpu.pipeline_mode<synchronous>, transform_indices = @transform_7, window_bounds = array<i64: 128, 128>}, {pipeline_mode = #tpu.pipeline_mode<synchronous>, transform_indices = @transform_8, window_bounds = array<i64: 1, 128>}, {transform_indices = @transform_9, window_bounds = array<i64: 8, 128>}]} {
    %c0 = arith.constant 0 : index
    %c0_0 = arith.constant 0 : index
    %0 = vector.load %arg1[%c0, %c0_0] : memref<8x896xbf16, #tpu.memory_space<vmem>>, vector<8x896xbf16>
    %c0_1 = arith.constant 0 : index
    %c0_2 = arith.constant 0 : index
    %1 = vector.load %arg2[%c0_1, %c0_2] : memref<896x128xbf16, #tpu.memory_space<vmem>>, vector<896x128xbf16>
    %cst = arith.constant dense<0.000000e+00> : vector<8x128xf32>
    %2 = tpu.matmul %0, %1, %cst {dimension_numbers = #tpu.dot_dimension_numbers<[1], [0], [0], [1], [0, 0, 1, 1], [], []>} : vector<8x896xbf16>, vector<896x128xbf16>, vector<8x128xf32> -> vector<8x128xf32>
    %c0_3 = arith.constant 0 : index
    %c0_4 = arith.constant 0 : index
    %3 = vector.load %arg3[%c0_3, %c0_4] : memref<1x128xf32, #tpu.memory_space<vmem>>, vector<1x128xf32>
    %4 = vector.broadcast %3 : vector<1x128xf32> to vector<8x128xf32>
    %5 = arith.addf %2, %4 : vector<8x128xf32>
    %cst_5 = arith.constant 0.000000e+00 : f32
    %6 = vector.broadcast %cst_5 : f32 to vector<8x128xf32>
    %7 = arith.maximumf %5, %6 : vector<8x128xf32>
    %8 = arith.truncf %7 : vector<8x128xf32> to vector<8x128xbf16>
    %c0_6 = arith.constant 0 : index
    %c0_7 = arith.constant 0 : index
    %9 = vector.load %arg4[%c0_6, %c0_7] : memref<128x128xbf16, #tpu.memory_space<vmem>>, vector<128x128xbf16>
    %cst_8 = arith.constant dense<0.000000e+00> : vector<8x128xf32>
    %10 = tpu.matmul %8, %9, %cst_8 {dimension_numbers = #tpu.dot_dimension_numbers<[1], [0], [0], [1], [0, 0, 1, 1], [], []>} : vector<8x128xbf16>, vector<128x128xbf16>, vector<8x128xf32> -> vector<8x128xf32>
    %c0_9 = arith.constant 0 : index
    %c0_10 = arith.constant 0 : index
    %11 = vector.load %arg5[%c0_9, %c0_10] : memref<1x128xf32, #tpu.memory_space<vmem>>, vector<1x128xf32>
    %12 = vector.broadcast %11 : vector<1x128xf32> to vector<8x128xf32>
    %13 = arith.addf %10, %12 : vector<8x128xf32>
    %cst_11 = arith.constant 0.000000e+00 : f32
    %14 = vector.broadcast %cst_11 : f32 to vector<8x128xf32>
    %15 = arith.maximumf %13, %14 : vector<8x128xf32>
    %16 = arith.truncf %15 : vector<8x128xf32> to vector<8x128xbf16>
    %c0_12 = arith.constant 0 : index
    %c0_13 = arith.constant 0 : index
    %17 = vector.load %arg6[%c0_12, %c0_13] : memref<128x128xbf16, #tpu.memory_space<vmem>>, vector<128x128xbf16>
    %cst_14 = arith.constant dense<0.000000e+00> : vector<8x128xf32>
    %18 = tpu.matmul %16, %17, %cst_14 {dimension_numbers = #tpu.dot_dimension_numbers<[1], [0], [0], [1], [0, 0, 1, 1], [], []>} : vector<8x128xbf16>, vector<128x128xbf16>, vector<8x128xf32> -> vector<8x128xf32>
    %c0_15 = arith.constant 0 : index
    %c0_16 = arith.constant 0 : index
    %19 = vector.load %arg7[%c0_15, %c0_16] : memref<1x128xf32, #tpu.memory_space<vmem>>, vector<1x128xf32>
    %20 = vector.broadcast %19 : vector<1x128xf32> to vector<8x128xf32>
    %21 = arith.addf %18, %20 : vector<8x128xf32>
    %cst_17 = arith.constant 0.000000e+00 : f32
    %22 = vector.broadcast %cst_17 : f32 to vector<8x128xf32>
    %23 = arith.maximumf %21, %22 : vector<8x128xf32>
    %24 = arith.truncf %23 : vector<8x128xf32> to vector<8x128xbf16>
    %c0_18 = arith.constant 0 : index
    %c0_19 = arith.constant 0 : index
    %25 = vector.load %arg8[%c0_18, %c0_19] : memref<128x128xbf16, #tpu.memory_space<vmem>>, vector<128x128xbf16>
    %cst_20 = arith.constant dense<0.000000e+00> : vector<8x128xf32>
    %26 = tpu.matmul %24, %25, %cst_20 {dimension_numbers = #tpu.dot_dimension_numbers<[1], [0], [0], [1], [0, 0, 1, 1], [], []>} : vector<8x128xbf16>, vector<128x128xbf16>, vector<8x128xf32> -> vector<8x128xf32>
    %c0_21 = arith.constant 0 : index
    %c0_22 = arith.constant 0 : index
    %27 = vector.load %arg9[%c0_21, %c0_22] : memref<1x128xf32, #tpu.memory_space<vmem>>, vector<1x128xf32>
    %28 = vector.broadcast %27 : vector<1x128xf32> to vector<8x128xf32>
    %29 = arith.addf %26, %28 : vector<8x128xf32>
    %cst_23 = arith.constant dense<0xFF800000> : vector<8xf32>
    %30 = vector.multi_reduction <maximumf>, %29, %cst_23 [1] : vector<8x128xf32> to vector<8xf32>
    %31 = vector.shape_cast %30 : vector<8xf32> to vector<8x1xf32>
    %32 = vector.broadcast %31 : vector<8x1xf32> to vector<8x128xf32>
    %33 = arith.subf %29, %32 : vector<8x128xf32>
    %34 = math.exp %33 : vector<8x128xf32>
    %cst_24 = arith.constant dense<0.000000e+00> : vector<8xf32>
    %35 = vector.multi_reduction <add>, %34, %cst_24 [1] : vector<8x128xf32> to vector<8xf32>
    %36 = vector.shape_cast %35 : vector<8xf32> to vector<8x1xf32>
    %37 = math.log %36 : vector<8x1xf32>
    %38 = vector.broadcast %37 : vector<8x1xf32> to vector<8x128xf32>
    %39 = arith.subf %33, %38 : vector<8x128xf32>
    %c0_25 = arith.constant 0 : index
    %c0_26 = arith.constant 0 : index
    %40 = vector.load %arg10[%c0_25, %c0_26] : memref<8x128xf32, #tpu.memory_space<vmem>>, vector<8x128xf32>
    tpu.vector_store %arg10[%c0_25, %c0_26], %39 {strides = array<i32>} : memref<8x128xf32, #tpu.memory_space<vmem>>, vector<8x128xf32>,
    return
  }
  func.func @transform_0(%arg0: i32) -> (i32, i32) {
    %c0_i32 = arith.constant 0 : i32
    %c0_i32_0 = arith.constant 0 : i32
    return %arg0, %c0_i32 : i32, i32
  }
  func.func @transform_1(%arg0: i32) -> (i32, i32) {
    %c0_i32 = arith.constant 0 : i32
    %c0_i32_0 = arith.constant 0 : i32
    %c0_i32_1 = arith.constant 0 : i32
    return %c0_i32, %c0_i32_0 : i32, i32
  }
  func.func @transform_2(%arg0: i32) -> (i32, i32) {
    %c0_i32 = arith.constant 0 : i32
    %c0_i32_0 = arith.constant 0 : i32
    %c0_i32_1 = arith.constant 0 : i32
    return %c0_i32, %c0_i32_0 : i32, i32
  }
  func.func @transform_3(%arg0: i32) -> (i32, i32) {
    %c0_i32 = arith.constant 0 : i32
    %c0_i32_0 = arith.constant 0 : i32
    %c0_i32_1 = arith.constant 0 : i32
    return %c0_i32, %c0_i32_0 : i32, i32
  }
  func.func @transform_4(%arg0: i32) -> (i32, i32) {
    %c0_i32 = arith.constant 0 : i32
    %c0_i32_0 = arith.constant 0 : i32
    %c0_i32_1 = arith.constant 0 : i32
    return %c0_i32, %c0_i32_0 : i32, i32
  }
  func.func @transform_5(%arg0: i32) -> (i32, i32) {
    %c0_i32 = arith.constant 0 : i32
    %c0_i32_0 = arith.constant 0 : i32
    %c0_i32_1 = arith.constant 0 : i32
    return %c0_i32, %c0_i32_0 : i32, i32
  }
  func.func @transform_6(%arg0: i32) -> (i32, i32) {
    %c0_i32 = arith.constant 0 : i32
    %c0_i32_0 = arith.constant 0 : i32
    %c0_i32_1 = arith.constant 0 : i32
    return %c0_i32, %c0_i32_0 : i32, i32
  }
  func.func @transform_7(%arg0: i32) -> (i32, i32) {
    %c0_i32 = arith.constant 0 : i32
    %c0_i32_0 = arith.constant 0 : i32
    %c0_i32_1 = arith.constant 0 : i32
    return %c0_i32, %c0_i32_0 : i32, i32
  }
  func.func @transform_8(%arg0: i32) -> (i32, i32) {
    %c0_i32 = arith.constant 0 : i32
    %c0_i32_0 = arith.constant 0 : i32
    %c0_i32_1 = arith.constant 0 : i32
    return %c0_i32, %c0_i32_0 : i32, i32
  }
  func.func @transform_9(%arg0: i32) -> (i32, i32) {
    %c0_i32 = arith.constant 0 : i32
    %c0_i32_0 = arith.constant 0 : i32
    return %arg0, %c0_i32 : i32, i32
  }
}

</mosaic_0001>

<bundles_post_ra>
// kernel: tpu_custom_call.1
= control target key start
LH: loop header
LB: loop body
LE: loop exit
PB: predicated region body
PF: predicated region fallthrough
CT: control target
= control target key end

     0   :  { %14 = vsyncpa [#allocation3], 0  ;;  %s1616_s0 = inlined_call_operand.hbm [shape: bf16[8,896], index: 0, kind: input, shape index: {}]   ;;  %s1617_s1 = inlined_call_operand.hbm [shape: bf16[896,128], index: 1, kind: input, shape index: {}]   ;;  %s1618_s2 = inlined_call_operand.vmem [shape: f32[1,128], index: 2, kind: input, shape index: {}]   ;;  %s1619_s3 = inlined_call_operand.hbm [shape: bf16[128,128], index: 3, kind: input, shape index: {}]   ;;  %s1620_s4 = inlined_call_operand.vmem [shape: f32[1,128], index: 4, kind: input, shape index: {}]   ;;  %s1621_s5 = inlined_call_operand.hbm [shape: bf16[128,128], index: 5, kind: input, shape index: {}]   ;;  %s1622_s6 = inlined_call_operand.vmem [shape: f32[1,128], index: 6, kind: input, shape index: {}]   ;;  %s1623_s7 = inlined_call_operand.hbm [shape: bf16[128,128], index: 7, kind: input, shape index: {}]   ;;  %s1624_s8 = inlined_call_operand.vmem [shape: f32[1,128], index: 8, kind: input, shape index: {}]   ;;  %s1625_s9 = inlined_call_operand.hbm [shape: f32[8,128], index: 9, kind: output, shape index: {}]  }
   0x1   :  { %15 = vsyncpa [#allocation6], 0 }
   0x2   :  { %16 = vsyncpa [#allocation9], 0  ;;  %s33_s11 = sshll.u32 %s1617_s1, 4  ;;  %s34_s11 = int_to_ptr.hbm [resolvable:$true] %s33_s11 }
   0x3   :  { %17 = vsyncpa [#allocation4], 0  ;;  %s1528_s12 = smov [#allocation5]   ;;  %s63_s16 = sshll.u32 %s1621_s5, 4  ;;  %s64_s16 = int_to_ptr.hbm [resolvable:$true] %s63_s16 }
   0x4   :  { %s35_s13 = sshll.u32 %s1528_s12, 4  ;;  %s1529_s17 = smov 64   ;;  %s36_s13 = int_to_ptr.vmem [resolvable:$true] %s35_s13 }
   0x5   :  { %s1530_s18 = smov 4   ;;  %s1531_s19 = smov [#allocation8]  }
   0x6   :  { %41 = dma.hbm_to_vmem [thread:$0]  %s34_s11, 7168, %s36_s13, [#allocation6], %s1529_s17, %s1529_s17, %s1530_s18  }
   0x7   :  { %s65_s20 = sshll.u32 %s1531_s19, 4  ;;  %s23_s23 = sshll.u32 %s1616_s0, 4  ;;  %s66_s20 = int_to_ptr.vmem [resolvable:$true] %s65_s20  ;;  %s24_s23 = int_to_ptr.hbm [resolvable:$true] %s23_s23 }
   0x8   :  { %71 = dma.hbm_to_vmem [thread:$0]  %s64_s16, 1024, %s66_s20, [#allocation9], %s1529_s17, %s1529_s17, %s1530_s18  }
   0x9   :  { %s48_s25 = sshll.u32 %s1619_s3, 4  ;;  %s1532_s26 = smov [#allocation2]   ;;  %s49_s25 = int_to_ptr.hbm [resolvable:$true] %s48_s25 }
   0xa   :  { %s25_s27 = sshll.u32 %s1532_s26, 4  ;;  %s1533_s5 = smov [#allocation7]   ;;  %s26_s27 = int_to_ptr.vmem [resolvable:$true] %s25_s27 }
   0xb   :  { %28 = dma.hbm_to_vmem [thread:$0]  %s24_s23, 448, %s26_s27, [#allocation3]  }
   0xc   :  { %s50_s28 = sshll.u32 %s1533_s5, 4  ;;  %s78_s10 = sshll.u32 %s1623_s7, 4  ;;  %s51_s28 = int_to_ptr.vmem [resolvable:$true] %s50_s28  ;;  %s79_s10 = int_to_ptr.hbm [resolvable:$true] %s78_s10 }
   0xd   :  { %56 = dma.hbm_to_vmem [thread:$0]  %s49_s25, 1024, %s51_s28, [#allocation6], %s1529_s17, %s1529_s17, %s1530_s18  }
   0xe   :  { %s1534_s0 = smov [#allocation10]  }
   0xf   :  { %s80_s11 = sshll.u32 %s1534_s0, 4  ;;  %s81_s11 = int_to_ptr.vmem [resolvable:$true] %s80_s11 }
  0x10   :  { %86 = dma.hbm_to_vmem [thread:$0]  %s79_s10, 1024, %s81_s11, [#allocation9], %s1529_s17, %s1529_s17, %s1530_s18  }
  0x11   :  { %1520 = dma.done.wait [#allocation3], 448  }
  0x12   :  { %1521 = vsyncadd [#allocation3], 4294966848 }
  0x13   :  { %1522 = dma.done.wait [#allocation6], 8192  }
  0x14   :  { %1523 = vsyncadd [#allocation6], 4294959104 }
  0x15   :  { %1524 = dma.done.wait [#allocation9], 2048  }
  0x16   :  { %1525 = vsyncadd [#allocation9], 4294965248  ;;  %v1287_v0 = vld [vmem:[#allocation5 + $0x38] sm:$0xff]  ;;  %v1286_v3 = vld [vmem:[#allocation5 + $0x30] sm:$0xff]  ;;  %s948_s19 = sshll.u32 %s1625_s9, 4  ;;  %s949_s19 = int_to_ptr.hbm [resolvable:$true] %s948_s19 }
  0x17   :  { %v1295_v1 = vld [vmem:[#allocation5 + $0x78] sm:$0xff]  ;;  %590 = vmatpush.bf16.msra.mxu0 %v1287_v0  ;;  %v1294_v4 = vld [vmem:[#allocation5 + $0x70] sm:$0xff]  ;;  %v1285_v7 = vld [vmem:[#allocation5 + $0x28] sm:$0xff] }
  0x18   :  { %v1303_v2 = vld [vmem:[#allocation5 + $0xb8] sm:$0xff]  ;;  %603 = vmatpush.bf16.msra.mxu1 %v1295_v1  ;;  %v1302_v5 = vld [vmem:[#allocation5 + $0xb0] sm:$0xff]  ;;  %v1293_v8 = vld [vmem:[#allocation5 + $0x68] sm:$0xff] }
  0x19   :  { %616 = vmatpush.bf16.msra.mxu2 %v1303_v2  ;;  %v1311_v6 = vld [vmem:[#allocation5 + $0xf8] sm:$0xff]  ;;  %v1301_v9 = vld [vmem:[#allocation5 + $0xa8] sm:$0xff]  ;;  %v1310_v10 = vld [vmem:[#allocation5 + $0xf0] sm:$0xff] }
  0x1a   :  { %629 = vmatpush.bf16.msra.mxu3 %v1311_v6  ;;  %v1284_v11 = vld [vmem:[#allocation5 + $0x20] sm:$0xff]  ;;  %v1309_v14 = vld [vmem:[#allocation5 + $0xe8] sm:$0xff]  ;;  %v1283_v15 = vld [vmem:[#allocation5 + $0x18] sm:$0xff] }
  0x1b   :  { %591 = vmatpush.bf16.msra.mxu0 %v1286_v3  ;;  %v1292_v12 = vld [vmem:[#allocation5 + $0x60] sm:$0xff]  ;;  %v1291_v16 = vld [vmem:[#allocation5 + $0x58] sm:$0xff]  ;;  %v1282_v19 = vld [vmem:[#allocation5 + $0x10] sm:$0xff] }
  0x1c   :  { %604 = vmatpush.bf16.msra.mxu1 %v1294_v4  ;;  %v1300_v13 = vld [vmem:[#allocation5 + $0xa0] sm:$0xff]  ;;  %v1299_v17 = vld [vmem:[#allocation5 + $0x98] sm:$0xff]  ;;  %v1290_v20 = vld [vmem:[#allocation5 + $0x50] sm:$0xff] }
  0x1d   :  { %617 = vmatpush.bf16.msra.mxu2 %v1302_v5  ;;  %v1308_v18 = vld [vmem:[#allocation5 + $0xe0] sm:$0xff]  ;;  %v1298_v21 = vld [vmem:[#allocation5 + $0x90] sm:$0xff]  ;;  %v1307_v22 = vld [vmem:[#allocation5 + $0xd8] sm:$0xff] }
  0x1e   :  { %630 = vmatpush.bf16.msra.mxu3 %v1310_v10  ;;  %v1281_v23 = vld [vmem:[#allocation5 + $0x8] sm:$0xff]  ;;  %v1306_v27 = vld [vmem:[#allocation5 + $0xd0] sm:$0xff]  ;;  %v1280_v30 = vld [vmem:[#allocation5] sm:$0xff] }
  0x1f   :  { %592 = vmatpush.bf16.msra.mxu0 %v1285_v7  ;;  %v1289_v24 = vld [vmem:[#allocation5 + $0x48] sm:$0xff]  ;;  %v1288_v31 = vld [vmem:[#allocation5 + $0x40] sm:$0xff]  ;;  %v1319_v35 = vld [vmem:[#allocation5 + $0x138] sm:$0xff] }
  0x20   :  { %605 = vmatpush.bf16.msra.mxu1 %v1293_v8  ;;  %v109_v25 = vld [vmem:[#allocation2] sm:$0xff]  ;;  %v110_v28 = vld [vmem:[#allocation2 + $0x8] sm:$0xff]  ;;  %v1327_v36 = vld [vmem:[#allocation5 + $0x178] sm:$0xff] }
  0x21   :  { %618 = vmatpush.bf16.msra.mxu2 %v1301_v9  ;;  %v1297_v26 = vld [vmem:[#allocation5 + $0x88] sm:$0xff]  ;;  %v233_v29 = vunpack.c.l.b16 %v109_v25  ;;  %v235_v32 = vunpack.c.l.b16 %v110_v28  ;;  %v234_v33 = vunpack.c.h.b16 %v109_v25  ;;  %v1296_v34 = vld [vmem:[#allocation5 + $0x80] sm:$0xff]  ;;  %v1335_v37 = vld [vmem:[#allocation5 + $0x1b8] sm:$0xff]  ;;  %v236_v46 = vunpack.c.h.b16 %v110_v28 }
  0x22   :  { %631 = vmatpush.bf16.msra.mxu3 %v1309_v14  ;;  %v1305_v39 = vld [vmem:[#allocation5 + $0xc8] sm:$0xff]  ;;  %v1318_v42 = vld [vmem:[#allocation5 + $0x130] sm:$0xff]  ;;  %v1304_v45 = vld [vmem:[#allocation5 + $0xc0] sm:$0xff] }
  0x23   :  { %593 = vmatpush.bf16.msra.mxu0 %v1284_v11  ;;  %v240_v38 = vpack.c.b16 %v233_v29, %v233_v29  ;;  %v242_v40 = vpack.c.b16 %v235_v32, %v235_v32  ;;  %v241_v41 = vpack.c.b16 %v234_v33, %v234_v33  ;;  %v1326_v43 = vld [vmem:[#allocation5 + $0x170] sm:$0xff]  ;;  %v1317_v47 = vld [vmem:[#allocation5 + $0x128] sm:$0xff]  ;;  %v243_v50 = vpack.c.b16 %v236_v46, %v236_v46  ;;  %v1316_v51 = vld [vmem:[#allocation5 + $0x120] sm:$0xff] }
  0x24   :  { %606 = vmatpush.bf16.msra.mxu1 %v1292_v12  ;;  %v1334_v44 = vld [vmem:[#allocation5 + $0x1b0] sm:$0xff]  ;;  %v1325_v48 = vld [vmem:[#allocation5 + $0x168] sm:$0xff]  ;;  %v1324_v52 = vld [vmem:[#allocation5 + $0x160] sm:$0xff] }
  0x25   :  { %619 = vmatpush.bf16.msra.mxu2 %v1300_v13  ;;  %v1333_v49 = vld [vmem:[#allocation5 + $0x1a8] sm:$0xff]  ;;  %v1332_v53 = vld [vmem:[#allocation5 + $0x1a0] sm:$0xff]  ;;  %v1315_v54 = vld [vmem:[#allocation5 + $0x118] sm:$0xff] }
  0x26   :  { %632 = vmatpush.bf16.msra.mxu3 %v1308_v18  ;;  %v1323_v55 = vld [vmem:[#allocation5 + $0x158] sm:$0xff]  ;;  %v1314_v57 = vld [vmem:[#allocation5 + $0x110] sm:$0xff]  ;;  %v1313_v60 = vld [vmem:[#allocation5 + $0x108] sm:$0xff] }
  0x27   :  { %594 = vmatpush.bf16.msra.mxu0 %v1283_v15  ;;  %v1331_v56 = vld [vmem:[#allocation5 + $0x198] sm:$0xff]  ;;  %v1322_v58 = vld [vmem:[#allocation5 + $0x150] sm:$0xff]  ;;  %v1321_v62 = vld [vmem:[#allocation5 + $0x148] sm:$0xff] }
  0x28   :  { %607 = vmatpush.bf16.msra.mxu1 %v1291_v16  ;;  %v1330_v59 = vld [vmem:[#allocation5 + $0x190] sm:$0xff]  ;;  %v1329_v63 = vld [vmem:[#allocation5 + $0x188] sm:$0xff]  ;;  %v112_v0 = vld [vmem:[#allocation2 + $0x18] sm:$0xf] }
  0x29   :  { %620 = vmatpush.bf16.msra.mxu2 %v1299_v17  ;;  %v111_v61 = vld [vmem:[#allocation2 + $0x10] sm:$0xff]  ;;  %v1312_v2 = vld [vmem:[#allocation5 + $0x100] sm:$0xff]  ;;  %v239_v4 = vunpack.c.l.b16 %v112_v0  ;;  %v1341_v12 = vld [vmem:[#allocation7 + $0x28] sm:$0xff] }
  0x2a   :  { %633 = vmatpush.bf16.msra.mxu3 %v1307_v22  ;;  %v237_v1 = vunpack.c.l.b16 %v111_v61  ;;  %v238_v3 = vunpack.c.h.b16 %v111_v61  ;;  %v1320_v5 = vld [vmem:[#allocation5 + $0x140] sm:$0xff]  ;;  %v1343_v10 = vld [vmem:[#allocation7 + $0x38] sm:$0xff]  ;;  %v1342_v11 = vld [vmem:[#allocation7 + $0x30] sm:$0xff] }
  0x2b   :  { %595 = vmatpush.bf16.msra.mxu0 %v1282_v19  ;;  %v1328_v6 = vld [vmem:[#allocation5 + $0x180] sm:$0xff]  ;;  %v246_v9 = vpack.c.b16 %v239_v4, %v239_v4  ;;  %v1339_v14 = vld [vmem:[#allocation7 + $0x18] sm:$0xff]  ;;  %v1338_v15 = vld [vmem:[#allocation7 + $0x10] sm:$0xff] }
  0x2c   :  { %608 = vmatpush.bf16.msra.mxu1 %v1290_v20  ;;  %v244_v7 = vpack.c.b16 %v237_v1, %v237_v1  ;;  %v245_v8 = vpack.c.b16 %v238_v3, %v238_v3  ;;  %v1340_v13 = vld [vmem:[#allocation7 + $0x20] sm:$0xff]  ;;  %v1337_v18 = vld [vmem:[#allocation7 + $0x8] sm:$0xff] }
  0x2d   :  { %621 = vmatpush.bf16.msra.mxu2 %v1298_v21  ;;  %v1336_v19 = vld [vmem:[#allocation7] sm:$0xff]  ;;  %v1349_v29 = vld [vmem:[#allocation8 + $0x28] sm:$0xff] }
  0x2e   :  { %634 = vmatpush.bf16.msra.mxu3 %v1306_v27  ;;  %v1348_v32 = vld [vmem:[#allocation8 + $0x20] sm:$0xff] }
  0x2f   :  { %596 = vmatpush.bf16.msra.mxu0 %v1281_v23  ;;  %v1351_v23 = vld [vmem:[#allocation8 + $0x38] sm:$0xff]  ;;  %v1370_v0 = vld [vmem:[%s1622_s6] ss:$0 sm:$0xff]  ;;  %s1535_s6 = smov [#allocation11]  }
  0x30   :  { %609 = vmatpush.bf16.msra.mxu1 %v1289_v24  ;;  %v1368_v24 = vld [vmem:[%s1618_s2] ss:$0 sm:$0xff]  ;;  %s946_s16 = sshll.u32 %s1535_s6, 4  ;;  %s947_s16 = int_to_ptr.vmem [resolvable:$true] %s946_s16 }
  0x31   :  { %622 = vmatpush.bf16.msra.mxu2 %v1297_v26  ;;  %v1350_v26 = vld [vmem:[#allocation8 + $0x30] sm:$0xff] }
  0x32   :  { %635 = vmatpush.bf16.msra.mxu3 %v1305_v39 }
  0x33   :  { %597 = vmatpush.bf16.msra.mxu0 %v1280_v30 }
  0x34   :  { %610 = vmatpush.bf16.msra.mxu1 %v1288_v31 }
  0x35   :  { %623 = vmatpush.bf16.msra.mxu2 %v1296_v34  ;;  %v1347_v34 = vld [vmem:[#allocation8 + $0x18] sm:$0xff] }
  0x36   :  { %598 = vmatmul.bf16.vlgmr.msra.gmra.mxu0 %v240_v38  ;;  %636 = vmatpush.bf16.msra.mxu3 %v1304_v45  ;;  %v1346_v38 = vld [vmem:[#allocation8 + $0x10] sm:$0xff] }
  0x37   :  { %642 = vmatpush.bf16.msrb.mxu0 %v1319_v35  ;;  %611 = vmatmul.bf16.vlgmr.msra.gmra.mxu1 %v241_v41 }
  0x38   :  { %655 = vmatpush.bf16.msrb.mxu1 %v1327_v36  ;;  %624 = vmatmul.bf16.vlgmr.msra.gmra.mxu2 %v242_v40 }
  0x39   :  { %668 = vmatpush.bf16.msrb.mxu2 %v1335_v37  ;;  %637 = vmatmul.bf16.vlgmr.msra.gmra.mxu3 %v243_v50  ;;  %v1359_v50 = vld [vmem:[#allocation10 + $0x38] sm:$0xff] }
  0x3a   :  { %751 = vmatpush.bf16.msrb.mxu3 %v1343_v10 }
  0x3b   :  { %643 = vmatpush.bf16.msrb.mxu0 %v1318_v42 }
  0x3c   :  { %656 = vmatpush.bf16.msrb.mxu1 %v1326_v43 }
  0x3d   :  { %669 = vmatpush.bf16.msrb.mxu2 %v1334_v44 }
  0x3e   :  { %752 = vmatpush.bf16.msrb.mxu3 %v1342_v11 }
  0x3f   :  { %644 = vmatpush.bf16.msrb.mxu0 %v1317_v47 }
  0x40   :  { %657 = vmatpush.bf16.msrb.mxu1 %v1325_v48  ;;  %v1345_v48 = vld [vmem:[#allocation8 + $0x8] sm:$0xff] }
  0x41   :  { %670 = vmatpush.bf16.msrb.mxu2 %v1333_v49  ;;  %v1344_v49 = vld [vmem:[#allocation8] sm:$0xff] }
  0x42   :  { %753 = vmatpush.bf16.msrb.mxu3 %v1341_v12 }
  0x43   :  { %645 = vmatpush.bf16.msrb.mxu0 %v1316_v51  ;;  %v1358_v51 = vld [vmem:[#allocation10 + $0x30] sm:$0xff] }
  0x44   :  { %658 = vmatpush.bf16.msrb.mxu1 %v1324_v52  ;;  %v1357_v52 = vld [vmem:[#allocation10 + $0x28] sm:$0xff] }
  0x45   :  { %671 = vmatpush.bf16.msrb.mxu2 %v1332_v53  ;;  %v1356_v53 = vld [vmem:[#allocation10 + $0x20] sm:$0xff] }
  0x46   :  { %754 = vmatpush.bf16.msrb.mxu3 %v1340_v13 }
  0x47   :  { %646 = vmatpush.bf16.msrb.mxu0 %v1315_v54  ;;  %v1355_v54 = vld [vmem:[#allocation10 + $0x18] sm:$0xff] }
  0x48   :  { %659 = vmatpush.bf16.msrb.mxu1 %v1323_v55  ;;  %v1354_v55 = vld [vmem:[#allocation10 + $0x10] sm:$0xff] }
  0x49   :  { %672 = vmatpush.bf16.msrb.mxu2 %v1331_v56  ;;  %v1369_v56 = vld [vmem:[%s1620_s4] ss:$0 sm:$0xff] }
  0x4a   :  { %755 = vmatpush.bf16.msrb.mxu3 %v1339_v14 }
  0x4b   :  { %647 = vmatpush.bf16.msrb.mxu0 %v1314_v57 }
  0x4c   :  { %660 = vmatpush.bf16.msrb.mxu1 %v1322_v58 }
  0x4d   :  { %673 = vmatpush.bf16.msrb.mxu2 %v1330_v59 }
  0x4e   :  { %756 = vmatpush.bf16.msrb.mxu3 %v1338_v15 }
  0x4f   :  { %648 = vmatpush.bf16.msrb.mxu0 %v1313_v60 }
  0x50   :  { %661 = vmatpush.bf16.msrb.mxu1 %v1321_v62  ;;  %v1353_v62 = vld [vmem:[#allocation10 + $0x8] sm:$0xff] }
  0x51   :  { %674 = vmatpush.bf16.msrb.mxu2 %v1329_v63  ;;  %v1352_v63 = vld [vmem:[#allocation10] sm:$0xff] }
  0x52   :  { %757 = vmatpush.bf16.msrb.mxu3 %v1337_v18 }
  0x53   :  { %649 = vmatpush.bf16.msrb.mxu0 %v1312_v2 }
  0x54   :  { %662 = vmatpush.bf16.msrb.mxu1 %v1320_v5 }
  0x55   :  { %675 = vmatpush.bf16.msrb.mxu2 %v1328_v6  ;;  %v1371_v6 = vld [vmem:[%s1624_s8] ss:$0 sm:$0xff] }
  0x56   :  { %650 = vmatmul.bf16.vlgmr.msrb.gmra.mxu0 %v244_v7  ;;  %758 = vmatpush.bf16.msrb.mxu3 %v1336_v19 }
  0x57   :  { %663 = vmatmul.bf16.vlgmr.msrb.gmra.mxu1 %v245_v8  ;;  %834 = vmatpush.bf16.msra.mxu0 %v1351_v23 }
  0x58   :  { %676 = vmatmul.bf16.vlgmr.msrb.gmra.mxu2 %v246_v9  ;;  %917 = vmatpush.bf16.msra.mxu1 %v1359_v50 }
  0x5b   :  { %835 = vmatpush.bf16.msra.mxu0 %v1350_v26 }
  0x5c   :  { %918 = vmatpush.bf16.msra.mxu1 %v1358_v51 }
  0x5f   :  { %836 = vmatpush.bf16.msra.mxu0 %v1349_v29 }
  0x60   :  { %919 = vmatpush.bf16.msra.mxu1 %v1357_v52 }
  0x63   :  { %837 = vmatpush.bf16.msra.mxu0 %v1348_v32 }
  0x64   :  { %920 = vmatpush.bf16.msra.mxu1 %v1356_v53 }
  0x67   :  { %838 = vmatpush.bf16.msra.mxu0 %v1347_v34 }
  0x68   :  { %921 = vmatpush.bf16.msra.mxu1 %v1355_v54 }
  0x6b   :  { %839 = vmatpush.bf16.msra.mxu0 %v1346_v38 }
  0x6c   :  { %922 = vmatpush.bf16.msra.mxu1 %v1354_v55 }
  0x6f   :  { %840 = vmatpush.bf16.msra.mxu0 %v1345_v48 }
  0x70   :  { %923 = vmatpush.bf16.msra.mxu1 %v1353_v62 }
  0x73   :  { %841 = vmatpush.bf16.msra.mxu0 %v1344_v49 }
  0x74   :  { %924 = vmatpush.bf16.msra.mxu1 %v1352_v63 }
  0xb3   :  { %v599_v16 = vpop.f32.mrf.mxu0 }
  0xb4   :  { %v612_v17 = vpop.f32.mrf.mxu1  ;;  %v600_v28 = vadd.f32 %v1368_v24, %v599_v16 }
  0xb6   :  { %v613_v30 = vadd.f32 %v612_v17, %v600_v28 }
  0xbb   :  { %v625_v20 = vpop.f32.mrf.mxu2  ;;  %v601_v21 = vpop.f32.mrf.mxu0 }
  0xbc   :  { %v614_v22 = vpop.f32.mrf.mxu1  ;;  %v638_v25 = vpop.f32.mrf.mxu3  ;;  %v626_v33 = vadd.f32 %v625_v20, %v613_v30 }
  0xbe   :  { %v639_v35 = vadd.f32 %v638_v25, %v626_v33 }
  0xc3   :  { %v627_v27 = vpop.f32.mrf.mxu2 }
  0xc4   :  { %v640_v31 = vpop.f32.mrf.mxu3 }
  0xd3   :  { %v651_v36 = vpop.f32.mrf.mxu0 }
  0xd4   :  { %v664_v37 = vpop.f32.mrf.mxu1  ;;  %v652_v39 = vadd.f32 %v651_v36, %v639_v35 }
  0xd6   :  { %v665_v40 = vadd.f32 %v664_v37, %v652_v39 }
  0xdb   :  { %v677_v41 = vpop.f32.mrf.mxu2  ;;  %v653_v43 = vpop.f32.mrf.mxu0 }
  0xdc   :  { %v678_v42 = vadd.f32 %v677_v41, %v665_v40  ;;  %v666_v44 = vpop.f32.mrf.mxu1 }
  0xde   :  { %v681_v45 = vmax.f32 %v678_v42, 0.0 }
  0xe0   :  { %v682_v46 = vpack.c.bf16 %v681_v45, %v681_v45 }
  0xe2   :  { %759 = vmatmul.bf16.vlgmr.msrb.gmra.mxu3 %v682_v46 }
  0xe3   :  { %v679_v47 = vpop.f32.mrf.mxu2 }
 0x165   :  { %v760_v57 = vpop.f32.mrf.mxu3 }
 0x166   :  { %v761_v58 = vadd.f32 %v1369_v56, %v760_v57 }
 0x168   :  { %v764_v59 = vmax.f32 %v761_v58, 0.0 }
 0x16a   :  { %v765_v60 = vpack.c.bf16 %v764_v59, %v764_v59 }
 0x16c   :  { %842 = vmatmul.bf16.vlgmr.msra.gmra.mxu0 %v765_v60 }
 0x16d   :  { %v762_v61 = vpop.f32.mrf.mxu3 }
 0x1e9   :  { %v843_v1 = vpop.f32.mrf.mxu0 }
 0x1ea   :  { %v844_v2 = vadd.f32 %v1370_v0, %v843_v1 }
 0x1ec   :  { %v847_v3 = vmax.f32 %v844_v2, 0.0 }
 0x1ee   :  { %v848_v4 = vpack.c.bf16 %v847_v3, %v847_v3 }
 0x1f0   :  { %925 = vmatmul.bf16.vlgmr.msra.gmra.mxu1 %v848_v4 }
 0x1f1   :  { %v845_v5 = vpop.f32.mrf.mxu0 }
 0x26d   :  { %v926_v7 = vpop.f32.mrf.mxu1 }
 0x26e   :  { %v927_v8 = vadd.f32 %v1371_v6, %v926_v7 }
 0x270   :  { %930 = vmax.xlane.f32.xlu0 %v927_v8 }
 0x275   :  { %v928_v9 = vpop.f32.mrf.mxu1 }
 0x2e3   :  { %v931_v10 = vpop.xlane.xlu0 %930 }
 0x2e4   :  { %v932_v11 = vsub.f32 %v927_v8, %v931_v10 }
 0x2e6   :  { %v933_v12 = vmul.f32 1.442695, %v932_v11 }
 0x2e8   :  { %1372 = vpow2.f32 %v933_v12 }
 0x2ee   :  { %v1373_v13 = vpop.eup %1372 }
 0x2ef   :  { %935 = vadd.xlane.f32.xlu0 %v1373_v13 }
 0x362   :  { %v936_v14 = vpop.xlane.xlu0 %935 }
 0x363   :  { %1374 = vlog2.f32 %v936_v14 }
 0x369   :  { %v1375_v15 = vpop.eup %1374 }
 0x36a   :  { %v938_v16 = vmul.f32 0.6931472, %v1375_v15 }
 0x36c   :  { %v939_v17 = vsub.f32 %v932_v11, %v938_v16 }
 0x36e   :  { %940 = vst [vmem:[#allocation11] sm:$0xff] %v939_v17 }
 0x36f   :  { %951 = dma.vmem_to_hbm [thread:$0]  %s947_s16, 128, %s949_s19, [#allocation4]  }
 0x370   :  { %1526 = dma.done.wait [#allocation4], 128  }
 0x371   :  { %1527 = vsyncadd [#allocation4], 4294967168 }
 0x372   :  { %956 = vsyncpa [#allocation3], 1 }
 0x373   :  { %957 = vsyncpa [#allocation6], 1 }
 0x374   :  { %958 = vsyncpa [#allocation9], 1 }
 0x375   :  { %959 = vsyncpa [#allocation4], 1 }

</bundles_post_ra>
